<compile_context>
chip_gen: v7x
topology: tpu7x:2x2x1
jax: 0.10.0
libtpu: 0.0.40
codegen_flags: <defaults>
</compile_context>

<pallas_src>
import jax
import jax.numpy as jnp
from jax.experimental import pallas as pl
from jax.experimental.pallas import tpu as pltpu


_BLOCK_BUDGET_BYTES = 4 * 1024 * 1024   # per x block; x is double-buffered by the pipeline
_MAX_HW_TILE = 4096                     # caps the unrolled per-step chunk loop at 32 vregs


def _make_mase_kernel(HW, hw_tile, needs_mask):
    n_chunk = hw_tile // 128

    def kernel(x_ref, w1_ref, b1_ref, w2_ref, b2_ref, o_ref, acc_ref):
        # x_ref:  (Bt, C, hw_tile)  native dtype -- Bt batch rows, one HW tile
        # w1_ref: (C, Ch) f32, b1_ref: (1, Ch) f32
        # w2_ref: (Ch, C) f32, b2_ref: (1, C) f32
        # o_ref:  (Bt, 1, C) f32   gate output
        # acc_ref:(Bt, C, 128) f32 lane-wise running-max accumulator (scratch)
        k = pl.program_id(1)

        @pl.when(k == 0)
        def _init():
            acc_ref[...] = jnp.full_like(acc_ref, -jnp.inf)

        xv = x_ref[...]                                        # (Bt, C, hw_tile)
        if needs_mask:
            # Only the final HW tile can hang off the end of the array; mask the
            # out-of-bounds tail with -inf so it cannot affect the max.
            pos = k * hw_tile + jax.lax.broadcasted_iota(jnp.int32, (1, 1, hw_tile), 2)
            xv = jnp.where(pos < HW, xv, -jnp.inf)

        # Lane-wise partial max: pure VPU elementwise maxima over 128-lane chunks.
        # The cross-lane (XLU) reduce is deferred to the finalize step.
        part = xv[:, :, 0:128]
        for i in range(1, n_chunk):
            part = jnp.maximum(part, xv[:, :, i * 128:(i + 1) * 128])
        acc_ref[...] = jnp.maximum(acc_ref[...], part.astype(jnp.float32))

        @pl.when(k == pl.num_programs(1) - 1)
        def _finalize():
            pooled = jnp.max(acc_ref[...], axis=-1)            # (Bt, C), single lane-reduce
            # excitation: Linear -> ReLU -> Linear -> Sigmoid (runs once per batch block)
            h = jnp.dot(pooled, w1_ref[...],
                        preferred_element_type=jnp.float32) + b1_ref[...]
            h = jnp.maximum(h, 0.0)
            y = jnp.dot(h, w2_ref[...],
                        preferred_element_type=jnp.float32) + b2_ref[...]
            y = jax.nn.sigmoid(y)                              # exp/recip on the EUP slot
            o_ref[...] = y.reshape(o_ref.shape).astype(o_ref.dtype)

    return kernel


def _auto_hw_tile(HW, C, *, elem_bytes=4, budget_bytes=_BLOCK_BUDGET_BYTES):
    """Multiple-of-128 HW tile that keeps one (1, C, tile) block within the budget.
    Never returns a non-128-multiple: ragged HW is handled with cdiv + masking."""
    hw_pad = -(-HW // 128) * 128
    max_t = max(128, (budget_bytes // max(1, C * elem_bytes)) // 128 * 128)
    t = min(hw_pad, max_t, _MAX_HW_TILE)
    while hw_pad % t != 0 and t > 128:
        t -= 128
    return t


def _auto_batch_tile(B, C, hw_tile, *, elem_bytes=4, budget_bytes=_BLOCK_BUDGET_BYTES):
    """Largest divisor of B whose block (+acc) fits the budget while keeping
    B // Bt >= 2 (when B >= 2) so v7x megacore can shard the batch axis."""
    best = 1
    for bt in range(1, B + 1):
        if B % bt:
            continue
        if bt * C * (hw_tile * elem_bytes + 128 * 4) > budget_bytes:
            continue
        if B >= 2 and (B // bt) < 2:
            continue
        best = bt
    return best


def mase_block(x, w1, b1, w2, b2, *, hw_tile=None, batch_tile=None):
    """x: (B, C, H, W). Returns (B, C, 1, 1), matching MASEblock.forward."""
    B, C, H, W = x.shape
    Ch = w1.shape[1]
    HW = H * W
    elem_bytes = x.dtype.itemsize

    if hw_tile is None:
        hw_tile = _auto_hw_tile(HW, C, elem_bytes=elem_bytes)
    assert hw_tile % 128 == 0, hw_tile
    if batch_tile is None:
        batch_tile = _auto_batch_tile(B, C, hw_tile, elem_bytes=elem_bytes)
    assert B % batch_tile == 0, (B, batch_tile)

    n_hw = pl.cdiv(HW, hw_tile)
    needs_mask = (HW % hw_tile) != 0

    # NOTE: no dtype cast on x -- the kernel reads it as-is (HBM-bound op).
    x_flat = x.reshape(B, C, HW)
    w1_f32 = w1.astype(jnp.float32)
    w2_f32 = w2.astype(jnp.float32)
    b1_2d = b1.reshape(1, Ch).astype(jnp.float32)
    b2_2d = b2.reshape(1, C).astype(jnp.float32)

    kernel = _make_mase_kernel(HW, hw_tile, needs_mask)

    param_bytes = 4 * (C * Ch * 2 + Ch + C)
    cost = pl.CostEstimate(
        flops=int(B * C * HW + 4 * B * C * Ch),
        transcendentals=int(B * C),
        bytes_accessed=int(B * C * HW * elem_bytes + param_bytes + B * C * 4),
    )

    out = pl.pallas_call(
        kernel,
        out_shape=jax.ShapeDtypeStruct((B, 1, C), jnp.float32),
        grid_spec=pltpu.PrefetchScalarGridSpec(
            num_scalar_prefetch=0,
            grid=(B // batch_tile, n_hw),
            in_specs=[
                pl.BlockSpec((batch_tile, C, hw_tile), lambda b, k: (b, 0, k)),
                pl.BlockSpec((C, Ch), lambda b, k: (0, 0)),   # weights stay VMEM-resident
                pl.BlockSpec((1, Ch), lambda b, k: (0, 0)),
                pl.BlockSpec((Ch, C), lambda b, k: (0, 0)),
                pl.BlockSpec((1, C), lambda b, k: (0, 0)),
            ],
            out_specs=pl.BlockSpec((batch_tile, 1, C), lambda b, k: (b, 0, 0)),
            scratch_shapes=[pltpu.VMEM((batch_tile, C, 128), jnp.float32)],
        ),
        compiler_params=pltpu.CompilerParams(
            dimension_semantics=("parallel", "arbitrary"),
        ),
        cost_estimate=cost,
    )(x_flat, w1_f32, b1_2d, w2_f32, b2_2d)

    return out.reshape(B, C, 1, 1).astype(x.dtype)


def _reference(x, w1, b1, w2, b2):
    # Pure-JAX f32 reference mirroring the PyTorch forward.
    pooled = jnp.max(x, axis=(2, 3))                     # (B, C)
    h = jnp.maximum(pooled @ w1 + b1, 0.0)
    y = jax.nn.sigmoid(h @ w2 + b2)
    return y[:, :, None, None]


if __name__ == "__main__":
    B, C, H, W = 2, 32, 16, 16
    r = 16
    Ch = C // r  # 2

    key = jax.random.PRNGKey(0)
    kx, k1, k2, k3, k4 = jax.random.split(key, 5)

    x = jax.random.normal(kx, (B, C, H, W), dtype=jnp.float32)
    # nn.Linear(in, out) weight is (out, in); we store transposed (in, out) for x @ w.
    w1 = jax.random.normal(k1, (C, Ch), dtype=jnp.float32) * 0.1
    b1 = jax.random.normal(k2, (Ch,), dtype=jnp.float32) * 0.1
    w2 = jax.random.normal(k3, (Ch, C), dtype=jnp.float32) * 0.1
    b2 = jax.random.normal(k4, (C,), dtype=jnp.float32) * 0.1

    # hw_tile=128 -> 2 reduction steps; batch_tile auto-selects 1 -> 2 parallel batch
    # blocks, exercising init / running-max / finalize plus the megacore-friendly grid.
    out = mase_block(x, w1, b1, w2, b2, hw_tile=128)
    out = jax.block_until_ready(out)

    ref = _reference(x, w1, b1, w2, b2)
    assert out.shape == (B, C, 1, 1), out.shape
    # Pooling pass is exact f32 now; tolerance only covers MXU default-precision
    # differences in the tiny excitation matmuls.
    assert jnp.allclose(out, ref, atol=1e-2, rtol=1e-2), "mismatch vs reference"

    print("KERNEL_OK")
</pallas_src>

<mosaic_0001>
module attributes {stable_mosaic.version = 11 : i64} {
  func.func @kernel(%arg0: i32, %arg1: i32, %arg2: memref<1x32x128xf32, #tpu.memory_space<vmem>>, %arg3: memref<32x2xf32, #tpu.memory_space<vmem>>, %arg4: memref<1x2xf32, #tpu.memory_space<vmem>>, %arg5: memref<2x32xf32, #tpu.memory_space<vmem>>, %arg6: memref<1x32xf32, #tpu.memory_space<vmem>>, %arg7: memref<1x1x32xf32, #tpu.memory_space<vmem>>, %arg8: memref<1x32x128xf32, #tpu.memory_space<vmem>>) attributes {dimension_semantics = [#tpu.dimension_semantics<parallel>, #tpu.dimension_semantics<arbitrary>], iteration_bounds = array<i64: 2, 2>, scalar_prefetch = 0 : i64, scratch_operands = 1 : i64, tpu.core_type = #tpu.core_type<tc>, window_params = [{transform_indices = @transform_0, window_bounds = array<i64: 1, 32, 128>}, {pipeline_mode = #tpu.pipeline_mode<synchronous>, transform_indices = @transform_1, window_bounds = array<i64: 32, 2>}, {pipeline_mode = #tpu.pipeline_mode<synchronous>, transform_indices = @transform_2, window_bounds = array<i64: 1, 2>}, {pipeline_mode = #tpu.pipeline_mode<synchronous>, transform_indices = @transform_3, window_bounds = array<i64: 2, 32>}, {pipeline_mode = #tpu.pipeline_mode<synchronous>, transform_indices = @transform_4, window_bounds = array<i64: 1, 32>}, {transform_indices = @transform_5, window_bounds = array<i64: 1, 1, 32>}]} {
    %c0_i32 = arith.constant 0 : i32
    %0 = arith.cmpi eq, %arg1, %c0_i32 : i32
    %1 = arith.extui %0 : i1 to i32
    %c0_i32_0 = arith.constant 0 : i32
    %2 = arith.cmpi ne, %1, %c0_i32_0 : i32
    scf.if %2 {
      %cst = arith.constant 0xFF800000 : f32
      %10 = vector.broadcast %cst : f32 to vector<1x32x128xf32>
      %c0_10 = arith.constant 0 : index
      %c0_11 = arith.constant 0 : index
      %c0_12 = arith.constant 0 : index
      %11 = vector.load %arg8[%c0_10, %c0_11, %c0_12] : memref<1x32x128xf32, #tpu.memory_space<vmem>>, vector<1x32x128xf32>
      tpu.vector_store %arg8[%c0_10, %c0_11, %c0_12], %10 {strides = array<i32>} : memref<1x32x128xf32, #tpu.memory_space<vmem>>, vector<1x32x128xf32>,
    } else {
    }
    %c0 = arith.constant 0 : index
    %c0_1 = arith.constant 0 : index
    %c0_2 = arith.constant 0 : index
    %3 = vector.load %arg2[%c0, %c0_1, %c0_2] : memref<1x32x128xf32, #tpu.memory_space<vmem>>, vector<1x32x128xf32>
    %c0_3 = arith.constant 0 : index
    %c0_4 = arith.constant 0 : index
    %c0_5 = arith.constant 0 : index
    %4 = vector.load %arg8[%c0_3, %c0_4, %c0_5] : memref<1x32x128xf32, #tpu.memory_space<vmem>>, vector<1x32x128xf32>
    %5 = arith.maximumf %4, %3 : vector<1x32x128xf32>
    %c0_6 = arith.constant 0 : index
    %c0_7 = arith.constant 0 : index
    %c0_8 = arith.constant 0 : index
    %6 = vector.load %arg8[%c0_6, %c0_7, %c0_8] : memref<1x32x128xf32, #tpu.memory_space<vmem>>, vector<1x32x128xf32>
    tpu.vector_store %arg8[%c0_6, %c0_7, %c0_8], %5 {strides = array<i32>} : memref<1x32x128xf32, #tpu.memory_space<vmem>>, vector<1x32x128xf32>,
    %c1_i32 = arith.constant 1 : i32
    %7 = arith.cmpi eq, %arg1, %c1_i32 : i32
    %8 = arith.extui %7 : i1 to i32
    %c0_i32_9 = arith.constant 0 : i32
    %9 = arith.cmpi ne, %8, %c0_i32_9 : i32
    scf.if %9 {
      %c0_10 = arith.constant 0 : index
      %c0_11 = arith.constant 0 : index
      %c0_12 = arith.constant 0 : index
      %10 = vector.load %arg8[%c0_10, %c0_11, %c0_12] : memref<1x32x128xf32, #tpu.memory_space<vmem>>, vector<1x32x128xf32>
      %cst = arith.constant dense<0xFF800000> : vector<1x32xf32>
      %11 = vector.multi_reduction <maximumf>, %10, %cst [2] : vector<1x32x128xf32> to vector<1x32xf32>
      %c0_13 = arith.constant 0 : index
      %c0_14 = arith.constant 0 : index
      %12 = vector.load %arg3[%c0_13, %c0_14] : memref<32x2xf32, #tpu.memory_space<vmem>>, vector<32x2xf32>
      %cst_15 = arith.constant dense<0.000000e+00> : vector<1x2xf32>
      %13 = tpu.matmul %11, %12, %cst_15 {dimension_numbers = #tpu.dot_dimension_numbers<[1], [0], [0], [1], [0, 0, 1, 1], [], []>} : vector<1x32xf32>, vector<32x2xf32>, vector<1x2xf32> -> vector<1x2xf32>
      %c0_16 = arith.constant 0 : index
      %c0_17 = arith.constant 0 : index
      %14 = vector.load %arg4[%c0_16, %c0_17] : memref<1x2xf32, #tpu.memory_space<vmem>>, vector<1x2xf32>
      %15 = arith.addf %13, %14 : vector<1x2xf32>
      %cst_18 = arith.constant 0.000000e+00 : f32
      %16 = vector.broadcast %cst_18 : f32 to vector<1x2xf32>
      %17 = arith.maximumf %15, %16 : vector<1x2xf32>
      %c0_19 = arith.constant 0 : index
      %c0_20 = arith.constant 0 : index
      %18 = vector.load %arg5[%c0_19, %c0_20] : memref<2x32xf32, #tpu.memory_space<vmem>>, vector<2x32xf32>
      %cst_21 = arith.constant dense<0.000000e+00> : vector<1x32xf32>
      %19 = tpu.matmul %17, %18, %cst_21 {dimension_numbers = #tpu.dot_dimension_numbers<[1], [0], [0], [1], [0, 0, 1, 1], [], []>} : vector<1x2xf32>, vector<2x32xf32>, vector<1x32xf32> -> vector<1x32xf32>
      %c0_22 = arith.constant 0 : index
      %c0_23 = arith.constant 0 : index
      %20 = vector.load %arg6[%c0_22, %c0_23] : memref<1x32xf32, #tpu.memory_space<vmem>>, vector<1x32xf32>
      %21 = arith.addf %19, %20 : vector<1x32xf32>
      %22 = arith.negf %21 : vector<1x32xf32>
      %23 = math.exp %22 : vector<1x32xf32>
      %cst_24 = arith.constant 1.000000e+00 : f32
      %24 = vector.broadcast %cst_24 : f32 to vector<1x32xf32>
      %25 = arith.addf %24, %23 : vector<1x32xf32>
      %26 = arith.divf %24, %25 : vector<1x32xf32>
      %27 = vector.shape_cast %26 : vector<1x32xf32> to vector<1x1x32xf32>
      %c0_25 = arith.constant 0 : index
      %c0_26 = arith.constant 0 : index
      %c0_27 = arith.constant 0 : index
      %28 = vector.load %arg7[%c0_25, %c0_26, %c0_27] : memref<1x1x32xf32, #tpu.memory_space<vmem>>, vector<1x1x32xf32>
      tpu.vector_store %arg7[%c0_25, %c0_26, %c0_27], %27 {strides = array<i32>} : memref<1x1x32xf32, #tpu.memory_space<vmem>>, vector<1x1x32xf32>,
    } else {
    }
    return
  }
  func.func @transform_0(%arg0: i32, %arg1: i32) -> (i32, i32, i32) {
    %c0_i32 = arith.constant 0 : i32
    %c0_i32_0 = arith.constant 0 : i32
    return %arg0, %c0_i32, %arg1 : i32, i32, i32
  }
  func.func @transform_1(%arg0: i32, %arg1: i32) -> (i32, i32) {
    %c0_i32 = arith.constant 0 : i32
    %c0_i32_0 = arith.constant 0 : i32
    %c0_i32_1 = arith.constant 0 : i32
    return %c0_i32, %c0_i32_0 : i32, i32
  }
  func.func @transform_2(%arg0: i32, %arg1: i32) -> (i32, i32) {
    %c0_i32 = arith.constant 0 : i32
    %c0_i32_0 = arith.constant 0 : i32
    %c0_i32_1 = arith.constant 0 : i32
    return %c0_i32, %c0_i32_0 : i32, i32
  }
  func.func @transform_3(%arg0: i32, %arg1: i32) -> (i32, i32) {
    %c0_i32 = arith.constant 0 : i32
    %c0_i32_0 = arith.constant 0 : i32
    %c0_i32_1 = arith.constant 0 : i32
    return %c0_i32, %c0_i32_0 : i32, i32
  }
  func.func @transform_4(%arg0: i32, %arg1: i32) -> (i32, i32) {
    %c0_i32 = arith.constant 0 : i32
    %c0_i32_0 = arith.constant 0 : i32
    %c0_i32_1 = arith.constant 0 : i32
    return %c0_i32, %c0_i32_0 : i32, i32
  }
  func.func @transform_5(%arg0: i32, %arg1: i32) -> (i32, i32, i32) {
    %c0_i32 = arith.constant 0 : i32
    %c0_i32_0 = arith.constant 0 : i32
    %c0_i32_1 = arith.constant 0 : i32
    return %arg0, %c0_i32, %c0_i32_0 : i32, i32, i32
  }
}

</mosaic_0001>

<bundles_post_ra>
// kernel: tpu_custom_call.1
= control target key start
LH: loop header
LB: loop body
LE: loop exit
PB: predicated region body
PF: predicated region fallthrough
CT: control target
= control target key end

     0   :  { %s1182_s0 = inlined_call_operand.hbm [shape: f32[2,32,256], index: 0, kind: input, shape index: {}]   ;;  %s1183_s1 = inlined_call_operand.vmem [shape: f32[32,2], index: 1, kind: input, shape index: {}]   ;;  %s1184_s2 = inlined_call_operand.vmem [shape: f32[1,2], index: 2, kind: input, shape index: {}]   ;;  %s1185_s3 = inlined_call_operand.vmem [shape: f32[2,32], index: 3, kind: input, shape index: {}]   ;;  %s1186_s4 = inlined_call_operand.vmem [shape: f32[1,32], index: 4, kind: input, shape index: {}]   ;;  %s1187_s5 = inlined_call_operand.hbm [shape: f32[2,1,32], index: 5, kind: output, shape index: {}]  }
   0x1   :  { %1192 = sst [smem:[#allocation12_spill]] %s1187_s5 }
   0x2   :  { %10 = vsyncpa [#allocation4], 0 }
   0x3   :  { %12 = vsyncpa [#allocation4 + $0x1], 0 }
   0x4   :  { %13 = vsyncpa [#allocation5], 0 }
   0x5   :  { %15 = vsyncpa [#allocation5 + $0x1], 0  ;;  %s940_s18 = smov 0   ;;  %s942_s19 = smov 0  }
   0x6   :  { %s944_s20 = smov 0   ;;  %s946_s21 = smov 0  }
   0x7   :  { %s948_s22 = smov 0   ;;  %s950_s23 = smov 0  }
   0x8   :  { %s952_s24 = smov 0   ;;  %s954_s25 = smov 0  }
   0x9   :  { %s956_s26 = smov 0   ;;  %s958_s27 = smov 0  }
   0xa   :  { %s960_s28 = smov 0  }
   0xb LB: > { %s587_s29 = sadd.s32 4294967295, %s899_s28   ;;  %s588_s30 = sadd.s32 4294967294, %s899_s28   ;;  %s899_s28 = sphi %s960_s28, %s21_s28   ;;  %s895_s27 = sphi %s958_s27, %s1216_s27   ;;  %s891_s26 = sphi %s956_s26, %s1215_s26   ;;  %s887_s25 = sphi %s954_s25, %s1214_s25   ;;  %s883_s24 = sphi %s952_s24, %s1213_s24   ;;  %s879_s23 = sphi %s950_s23, %s1212_s23   ;;  %s875_s22 = sphi %s948_s22, %s1211_s22   ;;  %s871_s21 = sphi %s946_s21, %s1210_s21   ;;  %s867_s20 = sphi %s944_s20, %s1209_s20   ;;  %s863_s19 = sphi %s942_s19, %s1208_s19   ;;  %s859_s18 = sphi %s940_s18, %s1207_s18  }
   0xc   : > { %s30_s6 = sadd.s32 1, %s891_s26  ;;  %s33_s7 = sadd.s32 1, %s895_s27 }
   0xd   : > { %p31_p0 = scmp.ge.s32.totalorder %s30_s6, 2  ;;  %s42_s8 = sadd.s32 1, %s879_s23 }
   0xe   : > { %p49_p1 = scmp.ne.s32.totalorder %s879_s23, %s875_s22  ;;  %p50_p2 = scmp.eq.s32.totalorder %s899_s28, 0 }
   0xf   : > { %s1218_s6 = smov (%p31_p0, %s30_s6), 0  ;;  %s1220_s7 = smov (!%p31_p0, %s33_s7), %s895_s27 }
  0x10   : > { %1193 = sst [smem:[#allocation9_spill]] %s1218_s6  ;;  %s38_s9 = ssub.s32 %s891_s26, %s1218_s6 }
  0x11   : > { %p1006_p3 = por %p50_p2, %p49_p1  ;;  %p35_p4 = scmp.ge.s32.totalorder %s1220_s7, 2 }
  0x12   : > { %p55_p5 = scmp.ne.s32.totalorder %s875_s22, %s871_s21  ;;  %p56_p6 = scmp.eq.s32.totalorder %s587_s29, 0 }
  0x13   : > { %s152_s11 = sadd.s32 1, %s867_s20  ;;  %s1222_s7 = smov (%p35_p4, %s1220_s7), 0 }
  0x14   : > { %1195 = sst [smem:[#allocation10_spill]] %s1222_s7  ;;  %p1014_p7 = por %p56_p6, %p55_p5 }
  0x15   : > { %p162_p8 = scmp.ne.s32.totalorder %s867_s20, %s863_s19  ;;  %s37_s13 = ssub.s32 %s895_s27, %s1222_s7 }
  0x16   : > { %p163_p9 = scmp.eq.s32.totalorder %s587_s29, 3  ;;  %s39_s14 = sor.u32 %s38_s9, %s37_s13 }
  0x17   : > { %p150_p10 = scmp.eq.s32.totalorder %s37_s13, 0  ;;  %p40_p11 = scmp.eq.s32.totalorder %s39_s14, 0 }
  0x18   : > { %p1022_p12 = por %p163_p9, %p162_p8  ;;  %p168_p13 = scmp.ne.s32.totalorder %s863_s19, %s859_s18 }
  0x19   : > { %s1027_s16 = scalar_select %p150_p10, %s867_s20, %s152_s11  }
  0x1a   : > { %s1197_s15 = scalar_select %p1022_p12, 1, 0 }
  0x1b   : > { %1198 = sst [smem:[#allocation11_spill]] %s1027_s16  ;;  %p169_p0 = scmp.eq.s32.totalorder %s588_s30, 3 }
  0x1c   : > { %s1030_s17 = scalar_select %p40_p11, %s879_s23, %s42_s8  }
  0x1d   : > { %p646_p1 = scmp.lt.s32.totalorder %s899_s28, 4  ;;  %p1035_p2 = por %p169_p0, %p168_p13 }
  0x1e   : > { %s201_s29 = sand.u32 1, %s879_s23   ;;  %s592_s13 = sshll.u32 %s895_s27, 3 }
  0x1f   : > { %s1199_s21 = scalar_select %p1035_p2, 1, 0 }
  0x20   : > { %s591_s9 = sshll.u32 %s201_s29, 5  ;;  %s210_s14 = sadd.s32 %s891_s26, %s592_s13 }
  0x21   : > { %s205_s7 = scalar_lea.vmem [#allocation3], %s591_s9  ;;  %s593_s5 = sshll.u32 %s210_s14, 7 }
  0x22   : > { %s213_s6 = sshll.u32 %s205_s7, 4  ;;  %s1047_s8 = scalar_lea.hbm %s1182_s0, %s593_s5  ;;  %s1042_s6 = int_to_ptr.vmem [resolvable:$true] %s213_s6 }
  0x23   : > { %p1051_p4 = pnand %p646_p1, %p1006_p3  ;;  %s1055_s7 = scalar_lea.sflag [#allocation4], %s201_s29 }
  0x24   : > { %s747_s9 = scalar_lea.hbm %s1047_s8, 512  ;;  %s752_s16 = scalar_lea.hbm %s1182_s0, 2048 }
  0x25   : > { %p748_p5 = scmp.ne.s32.totalorder %s1047_s8, %s747_s9  ;;  %p749_p6 = pneg %p1051_p4 }
  0x26   : > { %p753_p3 = scmp.lt.u32.totalorder %s1047_s8, %s1182_s0  ;;  %p754_p10 = scmp.lt.u32.totalorder %s752_s16, %s747_s9 }
  0x27   : > { %p750_p8 = pnand %p749_p6, %p748_p5  ;;  %p756_p13 = scmp.lt.u32.totalorder %s747_s9, %s1047_s8 }
  0x28   : > { %p755_p11 = por %p754_p10, %p753_p3 }
  0x29   : > { %p751_p9 = pneg %p750_p8 }
  0x2a   : > { %p757_p0 = por %p756_p13, %p755_p11 }
  0x2c   : > { %p758_p1 = pnand %p757_p0, %p751_p9 }
  0x2e   : > { %761 = shalt.err (!%p758_p1)
}
  0x2f   : > { %s762_s29 = scalar_lea.vmem %s1042_s6, 512  ;;  %s901_s11 = smov [#allocation3]  }
  0x30   : > { %p763_p5 = scmp.ne.s32.totalorder %s1042_s6, %s762_s29  ;;  %s767_s5 = sshll.u32 %s901_s11, 4  ;;  %s768_s5 = int_to_ptr.vmem [resolvable:$false] %s767_s5 }
  0x31   : > { %s769_s10 = scalar_lea.vmem %s768_s5, 1024  ;;  %p770_p12 = scmp.lt.s32.totalorder %s1042_s6, %s768_s5 }
  0x32   : > { %p765_p8 = pnand %p763_p5, %p749_p6  ;;  %p771_p3 = scmp.lt.s32.totalorder %s769_s10, %s762_s29 }
  0x34   : > { %p766_p2 = pneg %p765_p8  ;;  %p772_p10 = por %p771_p3, %p770_p12 }
  0x36   : > { %p773_p11 = pnand %p772_p10, %p766_p2 }
  0x38   : > { %776 = shalt.err (!%p773_p11)
}
  0x39   : > { %s902_s9 = smov 256   ;;  %s903_s16 = smov 128  }
  0x3a   : > { %s904_s13 = smov 8   ;;  %p594_p6 = scmp.ge.s32.totalorder %s899_s28, 1 }
  0x3b   : > { %641 = dma.hbm_to_vmem [thread:$0]  (!%p1051_p4), %s1047_s8, 512, %s1042_s6, %s1055_s7, %s902_s9, %s903_s16, %s904_s13  }
  0x3c   : > { %p221_p9 = scmp.lt.s32.totalorder %s899_s28, 5 }
  0x3e   : > { %p222_p13 = pnand %p594_p6, %p221_p9 }
  0x3f   : > { %s227_s14 = sand.u32 (!%p222_p13), 1, %s875_s22  }
  0x40   : > { %225 = sbr.rel (%p222_p13) target bundleno = 727 (0x2d7), region = 40  ;;  %s595_s29 = sshll.u32 (!%p222_p13), %s227_s14, 5 }
  0x41   : > { %s228_s11 = scalar_lea.sflag (!%p222_p13), [#allocation4], %s227_s14  ;;  %s231_s5 = scalar_lea.vmem (!%p222_p13), [#allocation3], %s595_s29 }
  0x47   : > { %850 = dma.done.wait (%p1014_p7), %s228_s11, 512  }
  0x48   : > { %852 = vsyncadd (%p1014_p7), %s228_s11, 4294966784  ;;  %s255_s10 = sand.u32 1, %s863_s19   ;;  %p596_p12 = scmp.ne.s32.totalorder %s883_s24, 0 }
  0x49   : > { %s1093_s6 = scalar_lea.vmem [#allocation6], %s255_s10  ;;  %v905_v0 = vmov (!%p596_p12), -inf  }
  0x4a   : > { %260 = sbr.rel (%p596_p12) target bundleno = 81 (0x51), region = 48  ;;  %261 = vst [vmem:[#allocation2] sm:$0xff] (!%p596_p12), %v905_v0  ;;  %262 = vst [vmem:[#allocation2 + $0x8] sm:$0xff] (!%p596_p12), %v905_v0 }
  0x4b   : > { %263 = vst [vmem:[#allocation2 + $0x10] sm:$0xff] (!%p596_p12), %v905_v0  ;;  %264 = vst [vmem:[#allocation2 + $0x18] sm:$0xff] (!%p596_p12), %v905_v0 }
  0x51 PF: > { %v265_v1 = vld [vmem:[%s231_s5] sm:$0xff]  ;;  %v266_v3 = vld [vmem:[%s231_s5 + $0x8] sm:$0xff]  ;;  %v267_v6 = vld [vmem:[%s231_s5 + $0x10] sm:$0xff]  ;;  %p597_p7 = scmp.ne.s32.totalorder %s883_s24, 1 }
  0x52   : > { %v269_v2 = vld [vmem:[#allocation2] sm:$0xff]  ;;  %v270_v5 = vld [vmem:[#allocation2 + $0x8] sm:$0xff]  ;;  %v271_v7 = vld [vmem:[#allocation2 + $0x10] sm:$0xff]  ;;  %v906_v20 = vmov (!%p597_p7), 0.0|0.0   ;;  %vm907_vm0 = vmmov (!%p597_p7), 0   ;;  %v908_v24 = vmov (!%p597_p7), 0.0   ;;  %v306_v25 = vlaneseq (!%p597_p7) }
  0x53   : > { %v273_v4 = vmax.f32 %v269_v2, %v265_v1  ;;  %v274_v8 = vmax.f32 %v270_v5, %v266_v3  ;;  %v275_v9 = vmax.f32 %v271_v7, %v267_v6  ;;  %v268_v10 = vld [vmem:[%s231_s5 + $0x18] sm:$0xff]  ;;  %284 = sbr.rel (%p597_p7) target bundleno = 701 (0x2bd), region = 52  ;;  %v297_v17 = vld [vmem:[%s1183_s1] sm:$0xff] (!%p597_p7)  ;;  %v298_v18 = vld [vmem:[%s1183_s1 + $0x8] sm:$0xff] (!%p597_p7)  ;;  %628 = vmatprep.subr.bf16.mxu0 (!%p597_p7), %v906_v20  ;;  %620 = vmatprep.mubr.msk.f32.mxu0 (!%p597_p7), %vm907_vm0, %v908_v24  ;;  %vm317_vm1 = vcmask (!%p597_p7), 130112  }
  0x54   : > { %v272_v11 = vld [vmem:[#allocation2 + $0x18] sm:$0xff]  ;;  %v629_v19 = vpack.c.bf16 (!%p597_p7), %v298_v18, %v297_v17  ;;  %v299_v21 = vld [vmem:[%s1183_s1 + $0x10] sm:$0xff] (!%p597_p7)  ;;  %623 = vmatprep.subr.mxu1 (!%p597_p7), %v908_v24  ;;  %625 = vmatprep.mubr.msk.f32.mxu1 (!%p597_p7), %vm907_vm0, %v908_v24  ;;  %v307_v26 = vand.u32 (!%p597_p7), 127, %v306_v25  ;;  %v309_v27 = vshrl.u32 (!%p597_p7), %v306_v25, 7  ;;  %vm324_vm2 = vcmask (!%p597_p7), 195712  }
  0x55   : > { %277 = vst [vmem:[#allocation2] sm:$0xff] %v273_v4  ;;  %v276_v12 = vmax.f32 %v272_v11, %v268_v10  ;;  %278 = vst [vmem:[#allocation2 + $0x8] sm:$0xff] %v274_v8  ;;  %v300_v22 = vld [vmem:[%s1183_s1 + $0x18] sm:$0xff] (!%p597_p7)  ;;  %vm331_vm3 = vcmask (!%p597_p7), 261312   ;;  %vm333_vm4 = vcmask (!%p597_p7), 261120   ;;  %vm413_vm5 = vcmask (!%p597_p7), 1041408  }
  0x56   : > { %279 = vst [vmem:[#allocation2 + $0x10] sm:$0xff] %v275_v9  ;;  %630 = vmatpush3.bf16.msra.mxu0 (!%p597_p7), %v629_v19  ;;  %v632_v23 = vpack.c.bf16 (!%p597_p7), %v300_v22, %v299_v21  ;;  %v312_v28 = vadd.s32 (!%p597_p7), 4294967288, %v307_v26  ;;  %v326_v29 = vadd.s32 (!%p597_p7), 4294967272, %v307_v26  ;;  %v319_v30 = vadd.s32 (!%p597_p7), 4294967280, %v307_v26  ;;  %v407_v46 = vld [vmem:[%s1185_s3] sm:$0x3] (!%p597_p7) }
  0x57   : > { %280 = vst [vmem:[#allocation2 + $0x18] sm:$0xff] %v276_v12  ;;  %631 = vmatprep.subr.bf16.mxu0 (!%p597_p7), %v906_v20  ;;  %v310_v33 = vsub.s32 (!%p597_p7), %v307_v26, %v309_v27  ;;  %624 = vmatpush3.msk.msra.mxu1 (!%p597_p7), %vm413_vm5, %v407_v46  ;;  %v301_v47 = vld [vmem:[%s1184_s2] sm:$0x1] (!%p597_p7)  ;;  %vm409_vm6 = vcmask (!%p597_p7), 15360   ;;  %vm493_vm7 = vcmask (!%p597_p7), 253952  }
  0x58   : > { %v315_v34 = vsub.s32 (!%p597_p7), %v312_v28, %v309_v27  ;;  %v329_v35 = vsub.s32 (!%p597_p7), %v326_v29, %v309_v27  ;;  %v322_v36 = vsub.s32 (!%p597_p7), %v319_v30, %v309_v27  ;;  %v408_v52 = vld [vmem:[%s1186_s4] sm:$0x1] (!%p597_p7) }
  0x5a   : > { %633 = vmatpush3.bf16.msra.mxu0 %v632_v23 }
  0x5c   : > { %v285_v13 = vld [vmem:[#allocation2] sm:$0xff]  ;;  %v286_v15 = vld [vmem:[#allocation2 + $0x8] sm:$0xff] }
  0x5d   : > { %v287_v14 = vld [vmem:[#allocation2 + $0x10] sm:$0xff]  ;;  %289 = vmax.xlane.f32.xlu0 %v285_v13 }
  0x5e   : > { %293 = vmax.xlane.f32.xlu1 %v287_v14  ;;  %v288_v16 = vld [vmem:[#allocation2 + $0x18] sm:$0xff] }
  0x61   : > { %291 = vmax.xlane.f32.xlu0 %v286_v15 }
  0x62   : > { %295 = vmax.xlane.f32.xlu1 %v288_v16 }
  0xea   : > { %v290_v31 = vpop.xlane.xlu0 %289 }
  0xeb   : > { %v294_v32 = vpop.xlane.xlu1 %293  ;;  %v311_v39 = vrot.slane %v290_v31, %v310_v33 }
  0xec   : > { %v323_v42 = vrot.slane %v294_v32, %v322_v36 }
  0xee   : > { %v292_v37 = vpop.xlane.xlu0 %291 }
  0xef   : > { %v296_v38 = vpop.xlane.xlu1 %295  ;;  %v316_v40 = vrot.slane %v292_v37, %v315_v34 }
  0xf0   : > { %v330_v41 = vrot.slane %v296_v38, %v329_v35 }
  0xf1   : > { %v318_v43 = vsel %vm317_vm1, %v316_v40, %v311_v39 }
  0xf2   : > { %v325_v44 = vsel %vm324_vm2, %v323_v42, %v318_v43 }
  0xf3   : > { %v332_v45 = vsel %vm331_vm3, %v330_v41, %v325_v44 }
  0xf4   : > { %621 = vmatmul.mubr.msk.f32.vlgmr.msra.gmra.mrb[0].mxu0 %vm333_vm4, %v332_v45 }
 0x1c7   : > { %v402_v48 = vpop.f32.mrb[0].mxu0 }
 0x1c8   : > { %v403_v49 = vadd.f32 %v402_v48, %v301_v47  ;;  %v622_v50 = vpop.f32.mrb[1].mxu0 }
 0x1ca   : > { %v406_v51 = vmax.f32 %v403_v49, 0.0 }
 0x1cc   : > { %626 = vmatmul.mubr.msk.f32.vlgmr.msra.gmra.mrb[0].mxu1 %vm409_vm6, %v406_v51 }
 0x29f   : > { %v483_v53 = vpop.f32.mrb[0].mxu1 }
 0x2a0   : > { %v484_v54 = vadd.f32 %v483_v53, %v408_v52  ;;  %v627_v55 = vpop.f32.mrb[1].mxu1 }
 0x2a2   : > { %v601_v56 = vmul.f32 -1.442695, %v484_v54 }
 0x2a4   : > { %743 = vpow2.f32 %v601_v56 }
 0x2ae   : > { %v744_v57 = vpop.eup %743 }
 0x2af   : > { %v490_v58 = vadd.f32 1.0, %v744_v57 }
 0x2b1   : > { %745 = vrcp.f32 %v490_v58 }
 0x2bb   : > { %v746_v59 = vpop.eup %745 }
 0x2bc   : > { %494 = vst.msk [vmem:[%s1093_s6] sm:$0x1] %vm493_vm7, %v746_v59 }
 0x2bd PF: > { %s602_s30 = sshll.u32 %s887_s25, 4  ;;  %s1201_s9 = sld [smem:[#allocation12_spill]] }
 0x2be   : > { %s508_s13 = sshll.u32 %s1093_s6, 4  ;;  %s496_s14 = scalar_lea.sflag [#allocation5], %s255_s10  ;;  %s509_s13 = int_to_ptr.vmem [resolvable:$true] %s508_s13 }
 0x2bf   : > { %s777_s29 = scalar_lea.vmem %s509_s13, 16  ;;  %p1202_p4 = scmp.ne.s32.totalorder %s1197_s15, 0 }
 0x2c0   : > { %p778_p2 = scmp.ne.s32.totalorder %s509_s13, %s777_s29  ;;  %s909_s11 = smov [#allocation6]  }
 0x2c1   : > { %s781_s5 = sshll.u32 %s909_s11, 4  ;;  %s782_s5 = int_to_ptr.vmem [resolvable:$false] %s781_s5 }
 0x2c2   : > { %p779_p0 = pnand %p778_p2, %p1202_p4  ;;  %s783_s12 = scalar_lea.vmem %s782_s5, 32 }
 0x2c3   : > { %s1123_s16 = scalar_lea.hbm %s1201_s9, %s602_s30  ;;  %p784_p5 = scmp.lt.s32.totalorder %s509_s13, %s782_s5 }
 0x2c4   : > { %p780_p1 = pneg %p779_p0  ;;  %p785_p8 = scmp.lt.s32.totalorder %s783_s12, %s777_s29 }
 0x2c6   : > { %p786_p3 = por %p785_p8, %p784_p5 }
 0x2c8   : > { %p787_p10 = pnand %p786_p3, %p780_p1 }
 0x2ca   : > { %790 = shalt.err (!%p787_p10)
}
 0x2cb   : > { %s791_s25 = scalar_lea.hbm %s1123_s16, 16  ;;  %s795_s8 = scalar_lea.hbm %s1201_s9, 32 }
 0x2cc   : > { %p792_p11 = scmp.ne.s32.totalorder %s1123_s16, %s791_s25  ;;  %p796_p13 = scmp.lt.u32.totalorder %s1123_s16, %s1201_s9 }
 0x2cd   : > { %p797_p12 = scmp.lt.u32.totalorder %s795_s8, %s791_s25  ;;  %p799_p2 = scmp.lt.u32.totalorder %s791_s25, %s1123_s16 }
 0x2ce   : > { %p793_p6 = pnand %p792_p11, %p1202_p4 }
 0x2cf   : > { %p798_p7 = por %p797_p12, %p796_p13 }
 0x2d0   : > { %p794_p9 = pneg %p793_p6 }
 0x2d1   : > { %p800_p0 = por %p799_p2, %p798_p7 }
 0x2d3   : > { %p801_p1 = pnand %p800_p0, %p794_p9 }
 0x2d5   : > { %804 = shalt.err (!%p801_p1)
}
 0x2d6   : > { %636 = dma.vmem_to_hbm [thread:$0]  (%p1202_p4), %s509_s13, 16, %s1123_s16, %s496_s14  }
 0x2d7 PF: > { %p647_p5 = scmp.ge.s32.totalorder %s899_s28, 2  ;;  %s520_s24 = sand.u32 1, %s859_s18  }
 0x2d8   : > { %p1203_p8 = scmp.ne.s32.totalorder %s1199_s21, 0  ;;  %s521_s29 = scalar_lea.sflag [#allocation5], %s520_s24 }
 0x2da   : > { %p643_p3 = pnand %p647_p5, %p1203_p8 }
 0x2dc   : > { %854 = dma.done.wait (!%p643_p3), %s521_s29, 16  }
 0x2dd   : > { %856 = vsyncadd (!%p643_p3), %s521_s29, 4294967280  ;;  %s21_s28 = sadd.s32 1, %s899_s28   ;;  %s1204_s11 = sld [smem:[#allocation11_spill]] }
 0x2de   : > { %p18_p10 = scmp.ge.s32.totalorder %s21_s28, 6   ;;  %s1205_s15 = sld [smem:[#allocation9_spill]] }
 0x2df   : > { %s1206_s16 = sld [smem:[#allocation10_spill]]  ;;  %s1207_s18 = smov %s863_s19 }
 0x2e0   : > { %s1208_s19 = smov %s867_s20  ;;  %s1210_s21 = smov %s875_s22 }
 0x2e1   : > { %s1211_s22 = smov %s879_s23  ;;  %s1212_s23 = smov %s1030_s17 }
 0x2e2   : > { %s1213_s24 = smov %s891_s26  ;;  %s1214_s25 = smov %s895_s27 }
 0x2e3   : > { %s1209_s20 = smov %s1204_s11  ;;  %20 = sbr.rel (!%p18_p10) target bundleno = 11 (0xb), region = 93 }
 0x2e4   : > { %s1215_s26 = smov %s1205_s15 }
 0x2e5   : > { %s1216_s27 = smov %s1206_s16 }
 0x2ea   :  { %525 = vsyncpa [#allocation4], 1 }
 0x2eb   :  { %527 = vsyncpa [#allocation4 + $0x1], 1 }
 0x2ec   :  { %528 = vsyncpa [#allocation5], 1 }
 0x2ed   :  { %530 = vsyncpa [#allocation5 + $0x1], 1 }

</bundles_post_ra>
